<compile_context>
chip_gen: v7x
topology: tpu7x:2x2x1
jax: 0.10.0
libtpu: 0.0.40
codegen_flags: <defaults>
</compile_context>

<pallas_src>
import functools

import jax
import jax.numpy as jnp
from jax.experimental import pallas as pl
from jax.experimental.pallas import tpu as pltpu


def _round_up(v, m):
    return -(-v // m) * m


def _pick_tile_ho(ho, w, cp, itemsize, budget_bytes=2 << 20):
    """Largest divisor of Ho whose input block fits a ~2 MiB VMEM budget."""
    tho = 1
    for cand in range(1, ho + 1):
        if ho % cand == 0 and (2 * cand) * w * cp * itemsize <= budget_bytes:
            tho = cand
    return tho


def transition_kernel(x_ref, scale_ref, bias_ref, w_ref, o_ref):
    # x_ref:     (1, THo, 2, Wo, 2*Cp)  compute dtype
    #            dims = (batch, h-tile, h-parity, w-pair, w-parity*channel);
    #            the 2x2 pool window lives in the h-parity dim and the
    #            lane-folded w-parity half of the last dim.
    # scale_ref: (1, 2*Cp) f32  folded BN scale, tiled over the w-parity fold
    # bias_ref:  (1, 2*Cp) f32
    # w_ref:     (Cp, Cop) compute dtype, 1x1 conv weight * 0.25 (pool factor)
    # o_ref:     (1, THo, Wo, Cop) f32
    tho = x_ref.shape[1]
    wo = x_ref.shape[3]
    cp = x_ref.shape[4] // 2
    cop = w_ref.shape[1]

    scale = scale_ref[...]
    bias = bias_ref[...]

    def bn_relu(v):  # BN (eval, folded) + ReLU in f32 on the VPU
        return jnp.maximum(v.astype(jnp.float32) * scale + bias, 0.0)

    # 2x2 sum-pool after the nonlinearity: H-pair via the parity dim,
    # W-pair via the 128-aligned lane fold.  (1/4 is folded into w_ref.)
    y = bn_relu(x_ref[0, :, 0, :, :]) + bn_relu(x_ref[0, :, 1, :, :])  # (THo, Wo, 2Cp)
    pooled = y[:, :, :cp] + y[:, :, cp:]                               # (THo, Wo, Cp)

    # 1x1 conv == channel matmul on the MXU (f32 accumulate).
    lhs = pooled.reshape(tho * wo, cp).astype(w_ref.dtype)
    z = jnp.dot(lhs, w_ref[...], preferred_element_type=jnp.float32)   # (THo*Wo, Cop)
    o_ref[0] = z.reshape(tho, wo, cop).astype(o_ref.dtype)


@functools.partial(jax.jit, static_argnames=("eps", "compute_dtype"))
def transition_block(x_nchw, gamma, beta, running_mean, running_var, conv_w,
                     eps=1e-5, compute_dtype=jnp.bfloat16):
    """BN(eval) -> ReLU -> 1x1 conv (no bias) -> 2x2 AvgPool; NCHW in / NCHW out."""
    # TODO(synk): BatchNorm is eval-mode only (running stats); training-mode
    # batch statistics are not reproduced.
    n, cin, h, w = x_nchw.shape
    cout = conv_w.shape[0]
    # TODO(synk): odd H/W (AvgPool2d floor behaviour) is not handled.
    assert h % 2 == 0 and w % 2 == 0, "even spatial dims required"
    ho, wo = h // 2, w // 2

    cp = _round_up(cin, 128)      # lane-dense channels for the MXU / stores
    cop = _round_up(cout, 128)

    # Fold BN into per-channel scale/bias (kept in f32), pad, tile for the
    # (w-parity, channel) lane fold.
    scale = (gamma / jnp.sqrt(running_var + eps)).astype(jnp.float32)
    bias = (beta - running_mean * scale).astype(jnp.float32)
    scale2 = jnp.tile(jnp.pad(scale, (0, cp - cin)), 2)[None, :]   # (1, 2*Cp)
    bias2 = jnp.tile(jnp.pad(bias, (0, cp - cin)), 2)[None, :]     # (1, 2*Cp)

    # 1x1 conv weight -> (Cin, Cout); fold the 2x2-average 1/4; pad; cast.
    w2d = conv_w.reshape(cout, cin).T.astype(jnp.float32) * 0.25
    w_p = jnp.pad(w2d, ((0, cp - cin), (0, cop - cout))).astype(compute_dtype)

    # NCHW -> NHWC, pad channels, cast to compute dtype (these fuse in XLA;
    # they vanish entirely in an NHWC end-to-end model), then a *free*
    # layout-preserving reshape exposing the 2x2 pool window:
    #   (N, H, W, Cp) -> (N, Ho, 2, Wo, 2*Cp)
    x = jnp.transpose(x_nchw, (0, 2, 3, 1)).astype(compute_dtype)
    x = jnp.pad(x, ((0, 0), (0, 0), (0, 0), (0, cp - cin)))
    x = x.reshape(n, ho, 2, wo, 2 * cp)

    tho = _pick_tile_ho(ho, w, cp, jnp.dtype(compute_dtype).itemsize)
    grid = (n, ho // tho)

    out = pl.pallas_call(
        transition_kernel,
        out_shape=jax.ShapeDtypeStruct((n, ho, wo, cop), jnp.float32),
        grid=grid,
        in_specs=[
            pl.BlockSpec((1, tho, 2, wo, 2 * cp), lambda i, j: (i, j, 0, 0, 0)),
            pl.BlockSpec((1, 2 * cp), lambda i, j: (0, 0)),
            pl.BlockSpec((1, 2 * cp), lambda i, j: (0, 0)),
            pl.BlockSpec((cp, cop), lambda i, j: (0, 0)),
        ],
        out_specs=pl.BlockSpec((1, tho, wo, cop), lambda i, j: (i, j, 0, 0)),
        compiler_params=pltpu.CompilerParams(
            dimension_semantics=("parallel", "parallel")),
    )(x, scale2, bias2, w_p)

    # Drop channel padding; the final transpose acts on the 4x-smaller pooled
    # tensor and fuses with the slice under jit.
    return jnp.transpose(out[..., :cout], (0, 3, 1, 2))


def reference(x_nchw, gamma, beta, running_mean, running_var, conv_w, eps=1e-5):
    scale = gamma / jnp.sqrt(running_var + eps)
    bias = beta - running_mean * scale
    y = jnp.maximum(x_nchw * scale[None, :, None, None] + bias[None, :, None, None], 0.0)
    w2d = conv_w.reshape(conv_w.shape[0], conv_w.shape[1])              # (Cout, Cin)
    z = jnp.einsum('nchw,oc->nohw', y, w2d, precision=jax.lax.Precision.HIGHEST)
    n, co, h, w = z.shape
    return z.reshape(n, co, h // 2, 2, w // 2, 2).mean(axis=(3, 5))


if __name__ == "__main__":
    key = jax.random.PRNGKey(0)
    N, Cin, Cout, H, W = 2, 4, 2, 16, 16

    kx, kg, kb, km, kv, kw = jax.random.split(key, 6)
    x = jax.random.normal(kx, (N, Cin, H, W), dtype=jnp.float32)
    gamma = jax.random.normal(kg, (Cin,), dtype=jnp.float32) * 0.1 + 1.0
    beta = jax.random.normal(kb, (Cin,), dtype=jnp.float32) * 0.1
    running_mean = jax.random.normal(km, (Cin,), dtype=jnp.float32) * 0.1
    running_var = jnp.abs(jax.random.normal(kv, (Cin,), dtype=jnp.float32)) * 0.5 + 0.5
    conv_w = jax.random.normal(kw, (Cout, Cin, 1, 1), dtype=jnp.float32) * (1.0 / jnp.sqrt(Cin))

    ref = reference(x, gamma, beta, running_mean, running_var, conv_w)

    # f32 compute path: tight check of the fused BN/ReLU/pool/conv math.
    out_f32 = transition_block(x, gamma, beta, running_mean, running_var, conv_w,
                               compute_dtype=jnp.float32)
    out_f32 = jax.block_until_ready(out_f32)
    assert out_f32.shape == (N, Cout, H // 2, W // 2), out_f32.shape
    assert jnp.allclose(out_f32, ref, atol=1e-4, rtol=1e-4), \
        float(jnp.max(jnp.abs(out_f32 - ref)))

    # bf16 compute path (default, the perf configuration): tolerance reflects
    # bf16 quantization of activations and weights.
    out_bf16 = transition_block(x, gamma, beta, running_mean, running_var, conv_w)
    out_bf16 = jax.block_until_ready(out_bf16)
    assert out_bf16.shape == (N, Cout, H // 2, W // 2), out_bf16.shape
    assert jnp.allclose(out_bf16, ref, atol=5e-2, rtol=5e-2), \
        float(jnp.max(jnp.abs(out_bf16 - ref)))

    print("KERNEL_OK")
</pallas_src>

<mosaic_0001>
module attributes {stable_mosaic.version = 11 : i64} {
  func.func @transition_kernel(%arg0: i32, %arg1: i32, %arg2: memref<1x8x2x8x256xf32, #tpu.memory_space<vmem>>, %arg3: memref<1x256xf32, #tpu.memory_space<vmem>>, %arg4: memref<1x256xf32, #tpu.memory_space<vmem>>, %arg5: memref<128x128xf32, #tpu.memory_space<vmem>>, %arg6: memref<1x8x8x128xf32, #tpu.memory_space<vmem>>) attributes {dimension_semantics = [#tpu.dimension_semantics<parallel>, #tpu.dimension_semantics<parallel>], iteration_bounds = array<i64: 2, 1>, scalar_prefetch = 0 : i64, scratch_operands = 0 : i64, tpu.core_type = #tpu.core_type<tc>, window_params = [{transform_indices = @transform_0, window_bounds = array<i64: 1, 8, 2, 8, 256>}, {pipeline_mode = #tpu.pipeline_mode<synchronous>, transform_indices = @transform_1, window_bounds = array<i64: 1, 256>}, {pipeline_mode = #tpu.pipeline_mode<synchronous>, transform_indices = @transform_2, window_bounds = array<i64: 1, 256>}, {pipeline_mode = #tpu.pipeline_mode<synchronous>, transform_indices = @transform_3, window_bounds = array<i64: 128, 128>}, {transform_indices = @transform_4, window_bounds = array<i64: 1, 8, 8, 128>}]} {
    %c0 = arith.constant 0 : index
    %c0_0 = arith.constant 0 : index
    %0 = vector.load %arg3[%c0, %c0_0] : memref<1x256xf32, #tpu.memory_space<vmem>>, vector<1x256xf32>
    %c0_1 = arith.constant 0 : index
    %c0_2 = arith.constant 0 : index
    %1 = vector.load %arg4[%c0_1, %c0_2] : memref<1x256xf32, #tpu.memory_space<vmem>>, vector<1x256xf32>
    %c0_3 = arith.constant 0 : index
    %c0_4 = arith.constant 0 : index
    %c0_5 = arith.constant 0 : index
    %c0_6 = arith.constant 0 : index
    %c0_7 = arith.constant 0 : index
    %2 = vector.load %arg2[%c0_3, %c0_4, %c0_5, %c0_6, %c0_7] : memref<1x8x2x8x256xf32, #tpu.memory_space<vmem>>, vector<1x8x1x8x256xf32>
    %3 = vector.shape_cast %2 : vector<1x8x1x8x256xf32> to vector<8x8x256xf32>
    %4 = vector.shape_cast %0 : vector<1x256xf32> to vector<1x1x256xf32>
    %5 = vector.broadcast %4 : vector<1x1x256xf32> to vector<8x8x256xf32>
    %6 = arith.mulf %3, %5 : vector<8x8x256xf32>
    %7 = vector.shape_cast %1 : vector<1x256xf32> to vector<1x1x256xf32>
    %8 = vector.broadcast %7 : vector<1x1x256xf32> to vector<8x8x256xf32>
    %9 = arith.addf %6, %8 : vector<8x8x256xf32>
    %cst = arith.constant 0.000000e+00 : f32
    %10 = vector.broadcast %cst : f32 to vector<8x8x256xf32>
    %11 = arith.maximumf %9, %10 : vector<8x8x256xf32>
    %c0_8 = arith.constant 0 : index
    %c0_9 = arith.constant 0 : index
    %c1 = arith.constant 1 : index
    %c0_10 = arith.constant 0 : index
    %c0_11 = arith.constant 0 : index
    %12 = vector.load %arg2[%c0_8, %c0_9, %c1, %c0_10, %c0_11] : memref<1x8x2x8x256xf32, #tpu.memory_space<vmem>>, vector<1x8x1x8x256xf32>
    %13 = vector.shape_cast %12 : vector<1x8x1x8x256xf32> to vector<8x8x256xf32>
    %14 = vector.shape_cast %0 : vector<1x256xf32> to vector<1x1x256xf32>
    %15 = vector.broadcast %14 : vector<1x1x256xf32> to vector<8x8x256xf32>
    %16 = arith.mulf %13, %15 : vector<8x8x256xf32>
    %17 = vector.shape_cast %1 : vector<1x256xf32> to vector<1x1x256xf32>
    %18 = vector.broadcast %17 : vector<1x1x256xf32> to vector<8x8x256xf32>
    %19 = arith.addf %16, %18 : vector<8x8x256xf32>
    %cst_12 = arith.constant 0.000000e+00 : f32
    %20 = vector.broadcast %cst_12 : f32 to vector<8x8x256xf32>
    %21 = arith.maximumf %19, %20 : vector<8x8x256xf32>
    %22 = arith.addf %11, %21 : vector<8x8x256xf32>
    %23 = vector.extract_strided_slice %22 {offsets = [0, 0, 0], sizes = [8, 8, 128], strides = [1, 1, 1]} : vector<8x8x256xf32> to vector<8x8x128xf32>
    %24 = vector.extract_strided_slice %22 {offsets = [0, 0, 128], sizes = [8, 8, 128], strides = [1, 1, 1]} : vector<8x8x256xf32> to vector<8x8x128xf32>
    %25 = arith.addf %23, %24 : vector<8x8x128xf32>
    %26 = vector.shape_cast %25 : vector<8x8x128xf32> to vector<64x128xf32>
    %c0_13 = arith.constant 0 : index
    %c0_14 = arith.constant 0 : index
    %27 = vector.load %arg5[%c0_13, %c0_14] : memref<128x128xf32, #tpu.memory_space<vmem>>, vector<128x128xf32>
    %cst_15 = arith.constant dense<0.000000e+00> : vector<64x128xf32>
    %28 = tpu.matmul %26, %27, %cst_15 {dimension_numbers = #tpu.dot_dimension_numbers<[1], [0], [0], [1], [0, 0, 1, 1], [], []>} : vector<64x128xf32>, vector<128x128xf32>, vector<64x128xf32> -> vector<64x128xf32>
    %29 = vector.shape_cast %28 : vector<64x128xf32> to vector<8x8x128xf32>
    %c0_16 = arith.constant 0 : index
    %c0_17 = arith.constant 0 : index
    %c0_18 = arith.constant 0 : index
    %c0_19 = arith.constant 0 : index
    %30 = vector.load %arg6[%c0_16, %c0_17, %c0_18, %c0_19] : memref<1x8x8x128xf32, #tpu.memory_space<vmem>>, vector<1x8x8x128xf32>
    %31 = vector.shape_cast %30 : vector<1x8x8x128xf32> to vector<8x8x128xf32>
    %32 = vector.shape_cast %29 : vector<8x8x128xf32> to vector<1x8x8x128xf32>
    tpu.vector_store %arg6[%c0_16, %c0_17, %c0_18, %c0_19], %32 {strides = array<i32>} : memref<1x8x8x128xf32, #tpu.memory_space<vmem>>, vector<1x8x8x128xf32>,
    return
  }
  func.func @transform_0(%arg0: i32, %arg1: i32) -> (i32, i32, i32, i32, i32) {
    %c0_i32 = arith.constant 0 : i32
    %c0_i32_0 = arith.constant 0 : i32
    %c0_i32_1 = arith.constant 0 : i32
    %c0_i32_2 = arith.constant 0 : i32
    return %arg0, %arg1, %c0_i32, %c0_i32_0, %c0_i32_1 : i32, i32, i32, i32, i32
  }
  func.func @transform_1(%arg0: i32, %arg1: i32) -> (i32, i32) {
    %c0_i32 = arith.constant 0 : i32
    %c0_i32_0 = arith.constant 0 : i32
    %c0_i32_1 = arith.constant 0 : i32
    return %c0_i32, %c0_i32_0 : i32, i32
  }
  func.func @transform_2(%arg0: i32, %arg1: i32) -> (i32, i32) {
    %c0_i32 = arith.constant 0 : i32
    %c0_i32_0 = arith.constant 0 : i32
    %c0_i32_1 = arith.constant 0 : i32
    return %c0_i32, %c0_i32_0 : i32, i32
  }
  func.func @transform_3(%arg0: i32, %arg1: i32) -> (i32, i32) {
    %c0_i32 = arith.constant 0 : i32
    %c0_i32_0 = arith.constant 0 : i32
    %c0_i32_1 = arith.constant 0 : i32
    return %c0_i32, %c0_i32_0 : i32, i32
  }
  func.func @transform_4(%arg0: i32, %arg1: i32) -> (i32, i32, i32, i32) {
    %c0_i32 = arith.constant 0 : i32
    %c0_i32_0 = arith.constant 0 : i32
    %c0_i32_1 = arith.constant 0 : i32
    return %arg0, %arg1, %c0_i32, %c0_i32_0 : i32, i32, i32, i32
  }
}

</mosaic_0001>

<bundles_post_ra>
// kernel: tile.13
= control target key start
LH: loop header
LB: loop body
LE: loop exit
PB: predicated region body
PF: predicated region fallthrough
CT: control target
= control target key end

     0   :  { %s22_s0 = inlined_call_operand.vmem [shape: f32[128], index: 0, kind: input, shape index: {}]   ;;  %s23_s1 = inlined_call_operand.vmem [shape: f32[2,128], index: 1, kind: output, shape index: {}]  }
   0x1   :  { %v4_v0 = vld [vmem:[%s22_s0] ss:$0 sm:$0xff] }
   0x2   :  { %5 = vst [vmem:[%s23_s1] sm:$0x3] %v4_v0 }

// kernel: transition_block.1
= control target key start
LH: loop header
LB: loop body
LE: loop exit
PB: predicated region body
PF: predicated region fallthrough
CT: control target
= control target key end

     0   :  { %s854_s15 = smov 0   ;;  %s856_s16 = smov 0   ;;  %s1081_s0 = inlined_call_operand.vmem [shape: f32[2,8,2,8,256], index: 0, kind: input, shape index: {}]   ;;  %s1082_s1 = inlined_call_operand.vmem [shape: f32[1,256], index: 1, kind: input, shape index: {}]   ;;  %s1083_s2 = inlined_call_operand.vmem [shape: f32[1,256], index: 2, kind: input, shape index: {}]   ;;  %s1084_s3 = inlined_call_operand.vmem [shape: f32[128,128], index: 3, kind: input, shape index: {}]   ;;  %s1085_s4 = inlined_call_operand.vmem [shape: f32[2,8,8,128], index: 4, kind: output, shape index: {}]  }
   0x1   :  { %s858_s17 = smov 0  }
   0x2 LB: > { %s26_s18 = sadd.s32 1, %s823_s16  ;;  %p640_p0 = scmp.ge.s32.totalorder %s827_s17, 1  ;;  %s827_s17 = sphi %s858_s17, %s14_s17   ;;  %s823_s16 = sphi %s856_s16, %s1087_s16   ;;  %s819_s15 = sphi %s854_s15, %s1086_s15  }
   0x3   : > { %p28_p1 = scmp.ge.s32.totalorder %s26_s18, 2  ;;  %p184_p2 = scmp.lt.s32.totalorder %s827_s17, 3 }
   0x5   : > { %s1089_s18 = smov (%p28_p1, %s26_s18), 0  ;;  %p185_p3 = pnand %p640_p0, %p184_p2 }
   0x6   : > { %v417_v0 = vld [vmem:[%s1084_s3] sm:$0xff] (!%p185_p3)  ;;  %v418_v1 = vld [vmem:[%s1084_s3 + $0x8] sm:$0xff] (!%p185_p3)  ;;  %v419_v2 = vld [vmem:[%s1084_s3 + $0x10] sm:$0xff] (!%p185_p3)  ;;  %p220_p4 = scmp.lt.s32.totalorder (!%p185_p3), %s819_s15, 1  ;;  %v259_v3 = vlaneseq (!%p185_p3) }
   0x7   : > { %188 = sbr.rel (%p185_p3) target bundleno = 268 (0x10c), region = 36  ;;  %v733_v4 = vpack.c.bf16 (!%p185_p3), %v418_v1, %v417_v0  ;;  %v420_v5 = vld [vmem:[%s1084_s3 + $0x18] sm:$0xff] (!%p185_p3)  ;;  %v421_v6 = vld [vmem:[%s1084_s3 + $0x20] sm:$0xff] (!%p185_p3)  ;;  %v422_v7 = vld [vmem:[%s1084_s3 + $0x28] sm:$0xff] (!%p185_p3) }
   0x8   : > { %v737_v8 = vpack.c.bf16 (!%p185_p3), %v420_v5, %v419_v2  ;;  %v423_v9 = vld [vmem:[%s1084_s3 + $0x30] sm:$0xff] (!%p185_p3)  ;;  %v424_v10 = vld [vmem:[%s1084_s3 + $0x38] sm:$0xff] (!%p185_p3)  ;;  %v425_v11 = vld [vmem:[%s1084_s3 + $0x40] sm:$0xff] (!%p185_p3)  ;;  %v260_v12 = vshrl.u32 (!%p185_p3), %v259_v3, 7  ;;  %v741_v21 = vpack.c.bf16 (!%p185_p3), %v422_v7, %v421_v6 }
   0x9   : > { %734 = vmatprep.subr.bf16.mxu0 (!%p185_p3), %v733_v4  ;;  %765 = vmatprep.subr.bf16.mxu1 (!%p185_p3), %v733_v4  ;;  %v426_v13 = vld [vmem:[%s1084_s3 + $0x48] sm:$0xff] (!%p185_p3)  ;;  %v427_v14 = vld [vmem:[%s1084_s3 + $0x50] sm:$0xff] (!%p185_p3)  ;;  %v428_v15 = vld [vmem:[%s1084_s3 + $0x58] sm:$0xff] (!%p185_p3)  ;;  %v920_v22 = vpack.c.bf16 (!%p185_p3), %v424_v10, %v423_v9 }
   0xa   : > { %736 = vmatpush3.bf16.msra.mxu0 (!%p185_p3), %v733_v4  ;;  %773 = vmatpush3.bf16.msra.mxu1 (!%p185_p3), %v733_v4  ;;  %v429_v16 = vld [vmem:[%s1084_s3 + $0x60] sm:$0xff] (!%p185_p3)  ;;  %v430_v17 = vld [vmem:[%s1084_s3 + $0x68] sm:$0xff] (!%p185_p3)  ;;  %v431_v18 = vld [vmem:[%s1084_s3 + $0x70] sm:$0xff] (!%p185_p3)  ;;  %v261_v19 = vsub.s32 (!%p185_p3), 0, %v260_v12  ;;  %v265_v20 = vsub.s32 (!%p185_p3), 1, %v260_v12  ;;  %v936_v26 = vpack.c.bf16 (!%p185_p3), %v426_v13, %v425_v11  ;;  %v947_v33 = vpack.c.bf16 (!%p185_p3), %v428_v15, %v427_v14 }
   0xb   : > { %738 = vmatprep.subr.bf16.mxu0 (!%p185_p3), %v737_v8  ;;  %766 = vmatprep.subr.bf16.mxu1 (!%p185_p3), %v737_v8  ;;  %v432_v23 = vld [vmem:[%s1084_s3 + $0x78] sm:$0xff] (!%p185_p3)  ;;  %v240_v24 = vld [vmem:[%s1082_s1] sm:$0x3] (!%p185_p3)  ;;  %v949_v34 = vpack.c.bf16 (!%p185_p3), %v430_v17, %v429_v16 }
   0xc   : > { %v241_v25 = vld [vmem:[%s1083_s2] sm:$0x3] (!%p185_p3)  ;;  %v940_v29 = vrot.slane (!%p185_p3), %v240_v24, %v261_v19  ;;  %v942_v30 = vrot.slane (!%p185_p3), %v240_v24, %v265_v20  ;;  %v951_v35 = vpack.c.bf16 (!%p185_p3), %v432_v23, %v431_v18 }
   0xd   : > { %v944_v31 = vrot.slane (!%p185_p3), %v241_v25, %v261_v19  ;;  %v953_v36 = vrot.slane (!%p185_p3), %v241_v25, %v265_v20 }
   0xe   : > { %s1091_s15 = smov (!%p220_p4, %s819_s15), 1  ;;  %740 = vmatpush3.bf16.msra.mxu0 %v737_v8  ;;  %774 = vmatpush3.bf16.msra.mxu1 %v737_v8 }
   0xf   : > { %s663_s27 = sshll.u32 %s1091_s15, 8  ;;  %742 = vmatprep.subr.bf16.mxu0 %v741_v21  ;;  %767 = vmatprep.subr.bf16.mxu1 %v741_v21  ;;  %s664_s11 = sshll.u32 %s1091_s15, 6 }
  0x10   : > { %s928_s6 = scalar_lea.vmem %s1081_s0, %s663_s27  ;;  %s238_s14 = scalar_lea.vmem %s1085_s4, %s664_s11 }
  0x11   : > { %v242_v27 = vld [vmem:[%s928_s6] sm:$0xff]  ;;  %v243_v28 = vld [vmem:[%s928_s6 + $0x8] sm:$0xff]  ;;  %v645_v32 = vld [vmem:[%s928_s6 + $0x10] sm:$0xff] }
  0x12   : > { %v646_v37 = vld [vmem:[%s928_s6 + $0x18] sm:$0xff]  ;;  %v250_v38 = vld [vmem:[%s928_s6 + $0x80] sm:$0xff]  ;;  %v251_v39 = vld [vmem:[%s928_s6 + $0x88] sm:$0xff]  ;;  %v269_v40 = vmul.f32 %v940_v29, %v242_v27  ;;  %v270_v41 = vmul.f32 %v942_v30, %v243_v28  ;;  %v345_v42 = vmul.f32 %v645_v32, %v940_v29  ;;  %744 = vmatpush3.bf16.msra.mxu0 %v741_v21  ;;  %775 = vmatpush3.bf16.msra.mxu1 %v741_v21 }
  0x13   : > { %v653_v43 = vld [vmem:[%s928_s6 + $0x90] sm:$0xff]  ;;  %v654_v44 = vld [vmem:[%s928_s6 + $0x98] sm:$0xff]  ;;  %v346_v45 = vmul.f32 %v646_v37, %v942_v30  ;;  %v277_v46 = vmul.f32 %v940_v29, %v250_v38  ;;  %v278_v47 = vmul.f32 %v942_v30, %v251_v39  ;;  %v244_v56 = vld [vmem:[%s928_s6 + $0x20] sm:$0xff]  ;;  %746 = vmatprep.subr.bf16.mxu0 %v920_v22  ;;  %768 = vmatprep.subr.bf16.mxu1 %v920_v22 }
  0x14   : > { %v296_v48 = vadd.f32 %v944_v31, %v269_v40  ;;  %v297_v49 = vadd.f32 %v953_v36, %v270_v41  ;;  %v361_v50 = vadd.f32 %v345_v42, %v944_v31  ;;  %v353_v51 = vmul.f32 %v653_v43, %v940_v29  ;;  %v245_v57 = vld [vmem:[%s928_s6 + $0x28] sm:$0xff]  ;;  %v647_v62 = vld [vmem:[%s928_s6 + $0x30] sm:$0xff]  ;;  %v648_v63 = vld [vmem:[%s928_s6 + $0x38] sm:$0xff] }
  0x15   : > { %v362_v52 = vadd.f32 %v346_v45, %v953_v36  ;;  %v304_v53 = vadd.f32 %v944_v31, %v277_v46  ;;  %v305_v54 = vadd.f32 %v953_v36, %v278_v47  ;;  %v354_v55 = vmul.f32 %v654_v44, %v942_v30  ;;  %v252_v12 = vld [vmem:[%s928_s6 + $0xa0] sm:$0xff]  ;;  %v253_v16 = vld [vmem:[%s928_s6 + $0xa8] sm:$0xff]  ;;  %v655_v17 = vld [vmem:[%s928_s6 + $0xb0] sm:$0xff] }
  0x16   : > { %v312_v58 = vmax.f32 %v296_v48, 0.0  ;;  %v313_v59 = vmax.f32 %v297_v49, 0.0  ;;  %v377_v60 = vmax.f32 %v361_v50, 0.0  ;;  %v369_v61 = vadd.f32 %v353_v51, %v944_v31  ;;  %748 = vmatpush3.bf16.msra.mxu0 %v920_v22  ;;  %776 = vmatpush3.bf16.msra.mxu1 %v920_v22  ;;  %v656_v21 = vld [vmem:[%s928_s6 + $0xb8] sm:$0xff]  ;;  %v246_v23 = vld [vmem:[%s928_s6 + $0x40] sm:$0xff]  ;;  %v247_v39 = vld [vmem:[%s928_s6 + $0x48] sm:$0xff] }
  0x17   : > { %v378_v0 = vmax.f32 %v362_v52, 0.0  ;;  %v320_v1 = vmax.f32 %v304_v53, 0.0  ;;  %v321_v2 = vmax.f32 %v305_v54, 0.0  ;;  %v370_v3 = vadd.f32 %v354_v55, %v953_v36  ;;  %750 = vmatprep.subr.bf16.mxu0 %v936_v26  ;;  %769 = vmatprep.subr.bf16.mxu1 %v936_v26  ;;  %v649_v44 = vld [vmem:[%s928_s6 + $0x50] sm:$0xff]  ;;  %v254_v52 = vld [vmem:[%s928_s6 + $0xc0] sm:$0xff] }
  0x18   : > { %v393_v4 = vadd.f32 %v377_v60, %v312_v58  ;;  %v385_v5 = vmax.f32 %v369_v61, 0.0  ;;  %v271_v6 = vmul.f32 %v940_v29, %v244_v56  ;;  %v272_v7 = vmul.f32 %v942_v30, %v245_v57  ;;  %v255_v57 = vld [vmem:[%s928_s6 + $0xc8] sm:$0xff] }
  0x19   : > { %v394_v8 = vadd.f32 %v378_v0, %v313_v59  ;;  %v386_v9 = vmax.f32 %v370_v3, 0.0  ;;  %v347_v10 = vmul.f32 %v647_v62, %v940_v29  ;;  %v348_v11 = vmul.f32 %v648_v63, %v942_v30  ;;  %v657_v62 = vld [vmem:[%s928_s6 + $0xd0] sm:$0xff]  ;;  %v658_v63 = vld [vmem:[%s928_s6 + $0xd8] sm:$0xff] }
  0x1a   : > { %v401_v13 = vadd.f32 %v385_v5, %v320_v1  ;;  %v298_v14 = vadd.f32 %v944_v31, %v271_v6  ;;  %v299_v15 = vadd.f32 %v953_v36, %v272_v7  ;;  %v279_v27 = vmul.f32 %v940_v29, %v252_v12  ;;  %752 = vmatpush3.bf16.msra.mxu0 %v936_v26  ;;  %v249_v12 = vld [vmem:[%s928_s6 + $0x68] sm:$0xff] }
  0x1b   : > { %v409_v18 = vadd.f32 %v394_v8, %v393_v4  ;;  %v402_v19 = vadd.f32 %v386_v9, %v321_v2  ;;  %v363_v20 = vadd.f32 %v347_v10, %v944_v31  ;;  %v364_v25 = vadd.f32 %v348_v11, %v953_v36  ;;  %777 = vmatpush3.bf16.msra.mxu1 %v936_v26  ;;  %v650_v26 = vld [vmem:[%s928_s6 + $0x58] sm:$0xff] }
  0x1c   : > { %v314_v24 = vmax.f32 %v298_v14, 0.0  ;;  %v315_v22 = vmax.f32 %v299_v15, 0.0  ;;  %v280_v37 = vmul.f32 %v942_v30, %v253_v16  ;;  %v355_v38 = vmul.f32 %v655_v17, %v940_v29  ;;  %754 = vmatprep.subr.bf16.mxu0 %v947_v33  ;;  %770 = vmatprep.subr.bf16.mxu1 %v947_v33  ;;  %v651_v17 = vld [vmem:[%s928_s6 + $0x70] sm:$0xff] }
  0x1d   : > { %721 = vmatprep.mubr.f32.mxu0 %v409_v18  ;;  %v413_v28 = vadd.f32 %v402_v19, %v401_v13  ;;  %v379_v32 = vmax.f32 %v363_v20, 0.0  ;;  %v380_v40 = vmax.f32 %v364_v25, 0.0  ;;  %v306_v41 = vadd.f32 %v944_v31, %v279_v27  ;;  %v652_v18 = vld [vmem:[%s928_s6 + $0x78] sm:$0xff] }
  0x1e   : > { %v356_v42 = vmul.f32 %v656_v21, %v942_v30  ;;  %v273_v43 = vmul.f32 %v940_v29, %v246_v23  ;;  %v307_v46 = vadd.f32 %v953_v36, %v280_v37  ;;  %v371_v47 = vadd.f32 %v355_v38, %v944_v31  ;;  %756 = vmatpush3.bf16.msra.mxu0 %v947_v33  ;;  %v256_v23 = vld [vmem:[%s928_s6 + $0xe0] sm:$0xff] }
  0x1f   : > { %v395_v45 = vadd.f32 %v379_v32, %v314_v24  ;;  %727 = vmatprep.mubr.f32.mxu1 %v413_v28  ;;  %v396_v48 = vadd.f32 %v380_v40, %v315_v22  ;;  %v322_v49 = vmax.f32 %v306_v41, 0.0  ;;  %v274_v51 = vmul.f32 %v942_v30, %v247_v39  ;;  %778 = vmatpush3.bf16.msra.mxu1 %v947_v33  ;;  %v248_v33 = vld [vmem:[%s928_s6 + $0x60] sm:$0xff]  ;;  %v257_v39 = vld [vmem:[%s928_s6 + $0xe8] sm:$0xff]  ;;  %v659_v40 = vld [vmem:[%s928_s6 + $0xf0] sm:$0xff] }
  0x20   : > { %v372_v50 = vadd.f32 %v356_v42, %v953_v36  ;;  %v323_v53 = vmax.f32 %v307_v46, 0.0  ;;  %v387_v54 = vmax.f32 %v371_v47, 0.0  ;;  %v300_v55 = vadd.f32 %v944_v31, %v273_v43  ;;  %758 = vmatprep.subr.bf16.mxu0 %v949_v34  ;;  %771 = vmatprep.subr.bf16.mxu1 %v949_v34 }
  0x21   : > { %v349_v56 = vmul.f32 %v649_v44, %v940_v29  ;;  %v410_v58 = vadd.f32 %v396_v48, %v395_v45  ;;  %v301_v60 = vadd.f32 %v953_v36, %v274_v51  ;;  %v350_v61 = vmul.f32 %v650_v26, %v942_v30  ;;  %v660_v45 = vld [vmem:[%s928_s6 + $0xf8] sm:$0xff] }
  0x22   : > { %v388_v59 = vmax.f32 %v372_v50, 0.0  ;;  %v403_v0 = vadd.f32 %v387_v54, %v322_v49  ;;  %v316_v1 = vmax.f32 %v300_v55, 0.0  ;;  %v281_v3 = vmul.f32 %v940_v29, %v254_v52  ;;  %760 = vmatpush3.bf16.msra.mxu0 %v949_v34 }
  0x23   : > { %v365_v2 = vadd.f32 %v349_v56, %v944_v31  ;;  %v317_v5 = vmax.f32 %v301_v60, 0.0  ;;  %v366_v6 = vadd.f32 %v350_v61, %v953_v36  ;;  %v282_v7 = vmul.f32 %v942_v30, %v255_v57  ;;  %779 = vmatpush3.bf16.msra.mxu1 %v949_v34  ;;  %762 = vmatprep.subr.bf16.mxu0 %v951_v35 }
  0x24   : > { %v404_v4 = vadd.f32 %v388_v59, %v323_v53  ;;  %v308_v9 = vadd.f32 %v944_v31, %v281_v3  ;;  %v357_v10 = vmul.f32 %v657_v62, %v940_v29  ;;  %v358_v11 = vmul.f32 %v658_v63, %v942_v30  ;;  %772 = vmatprep.subr.bf16.mxu1 %v951_v35 }
  0x25   : > { %v381_v8 = vmax.f32 %v365_v2, 0.0  ;;  %v382_v14 = vmax.f32 %v366_v6, 0.0  ;;  %v309_v15 = vadd.f32 %v953_v36, %v282_v7  ;;  %v275_v16 = vmul.f32 %v940_v29, %v248_v33 }
  0x26   : > { %v414_v13 = vadd.f32 %v404_v4, %v403_v0  ;;  %v324_v20 = vmax.f32 %v308_v9, 0.0  ;;  %v373_v21 = vadd.f32 %v357_v10, %v944_v31  ;;  %v374_v34 = vadd.f32 %v358_v11, %v953_v36  ;;  %764 = vmatpush3.bf16.msra.mxu0 %v951_v35 }
  0x27   : > { %v397_v19 = vadd.f32 %v381_v8, %v316_v1  ;;  %v398_v24 = vadd.f32 %v382_v14, %v317_v5  ;;  %v325_v22 = vmax.f32 %v309_v15, 0.0  ;;  %v276_v25 = vmul.f32 %v942_v30, %v249_v12  ;;  %780 = vmatpush3.bf16.msra.mxu1 %v951_v35 }
  0x28   : > { %v302_v27 = vadd.f32 %v944_v31, %v275_v16  ;;  %v389_v28 = vmax.f32 %v373_v21, 0.0  ;;  %v390_v32 = vmax.f32 %v374_v34, 0.0  ;;  %v351_v37 = vmul.f32 %v651_v17, %v940_v29 }
  0x29   : > { %v352_v38 = vmul.f32 %v652_v18, %v942_v30  ;;  %v411_v41 = vadd.f32 %v398_v24, %v397_v19  ;;  %v303_v42 = vadd.f32 %v953_v36, %v276_v25  ;;  %v283_v44 = vmul.f32 %v940_v29, %v256_v23  ;;  %722 = vmatmul.mubr.f32.vlgmr.msra.gmra.mrb[0].mxu0 %v410_v58 }
  0x2a   : > { %v318_v43 = vmax.f32 %v302_v27, 0.0  ;;  %v405_v46 = vadd.f32 %v389_v28, %v324_v20  ;;  %v406_v47 = vadd.f32 %v390_v32, %v325_v22  ;;  %v367_v26 = vadd.f32 %v351_v37, %v944_v31  ;;  %728 = vmatmul.mubr.f32.vlgmr.msra.gmra.mrb[0].mxu1 %v414_v13 }
  0x2b   : > { %v368_v48 = vadd.f32 %v352_v38, %v953_v36  ;;  %v319_v49 = vmax.f32 %v303_v42, 0.0  ;;  %v284_v50 = vmul.f32 %v942_v30, %v257_v39  ;;  %v310_v51 = vadd.f32 %v944_v31, %v283_v44  ;;  %724 = vmatprep.mubr.f32.mxu0 %v411_v41 }
  0x2c   : > { %v359_v35 = vmul.f32 %v659_v40, %v940_v29  ;;  %v415_v52 = vadd.f32 %v406_v47, %v405_v46  ;;  %v383_v53 = vmax.f32 %v367_v26, 0.0  ;;  %v360_v55 = vmul.f32 %v660_v45, %v942_v30 }
  0x2d   : > { %v384_v54 = vmax.f32 %v368_v48, 0.0  ;;  %v311_v56 = vadd.f32 %v953_v36, %v284_v50  ;;  %v326_v57 = vmax.f32 %v310_v51, 0.0 }
  0x2e   : > { %v375_v59 = vadd.f32 %v359_v35, %v944_v31  ;;  %730 = vmatprep.mubr.f32.mxu1 %v415_v52  ;;  %v399_v60 = vadd.f32 %v383_v53, %v318_v43  ;;  %v376_v62 = vadd.f32 %v360_v55, %v953_v36 }
  0x2f   : > { %v400_v61 = vadd.f32 %v384_v54, %v319_v49  ;;  %v327_v29 = vmax.f32 %v311_v56, 0.0 }
  0x30   : > { %v391_v58 = vmax.f32 %v375_v59, 0.0  ;;  %v392_v0 = vmax.f32 %v376_v62, 0.0 }
  0x31   : > { %v412_v63 = vadd.f32 %v400_v61, %v399_v60 }
  0x32   : > { %v407_v1 = vadd.f32 %v391_v58, %v326_v57  ;;  %v408_v2 = vadd.f32 %v392_v0, %v327_v29 }
  0x33   : > { %725 = vmatmul.mubr.f32.gmra.mrb[2].mxu0 %v412_v63 }
  0x34   : > { %v416_v30 = vadd.f32 %v408_v2, %v407_v1 }
  0x36   : > { %731 = vmatmul.mubr.f32.gmra.mrb[2].mxu1 %v416_v30 }
  0xfc   : > { %v723_v31 = vpop.f32.mrb[0].mxu0 }
  0xfd   : > { %v729_v3 = vpop.f32.mrb[0].mxu1  ;;  %539 = vst [vmem:[%s238_s14 + $0x8] sm:$0xff] %v723_v31  ;;  %v499_v33 = vpop.f32.mrb[1].mxu0 }
  0xfe   : > { %543 = vst [vmem:[%s238_s14 + $0x28] sm:$0xff] %v729_v3  ;;  %v519_v36 = vpop.f32.mrb[1].mxu1  ;;  %538 = vst [vmem:[%s238_s14] sm:$0xff] %v499_v33 }
  0xff   : > { %542 = vst [vmem:[%s238_s14 + $0x20] sm:$0xff] %v519_v36 }
 0x106   : > { %v726_v4 = vpop.f32.mrb[2].mxu0 }
 0x107   : > { %541 = vst [vmem:[%s238_s14 + $0x18] sm:$0xff] %v726_v4  ;;  %v509_v5 = vpop.f32.mrb[3].mxu0 }
 0x108   : > { %540 = vst [vmem:[%s238_s14 + $0x10] sm:$0xff] %v509_v5 }
 0x109   : > { %v732_v6 = vpop.f32.mrb[2].mxu1 }
 0x10a   : > { %545 = vst [vmem:[%s238_s14 + $0x38] sm:$0xff] %v732_v6  ;;  %v529_v7 = vpop.f32.mrb[3].mxu1 }
 0x10b   : > { %544 = vst [vmem:[%s238_s14 + $0x30] sm:$0xff] %v529_v7 }
 0x10c PF: > { %s14_s17 = sadd.s32 1, %s827_s17   ;;  %s1086_s15 = smov %s823_s16 }
 0x10d   : > { %p11_p5 = scmp.ge.s32.totalorder %s14_s17, 4   ;;  %s1087_s16 = smov %s1089_s18 }
 0x10f   :  { %13 = sbr.rel (!%p11_p5) target bundleno = 2 (0x2), region = 67 }

</bundles_post_ra>
